<compile_context>
chip_gen: v5e
topology: v5e:2x2
jax: 0.10.0
libtpu: 0.0.40
codegen_flags: <defaults>
</compile_context>

<pallas_src>
import jax
import jax.numpy as jnp
import numpy as np
from jax.experimental import pallas as pl
from jax.experimental.pallas import tpu as pltpu

LANE = 128


def _round_up(x, m):
    return (x + m - 1) // m * m


def gcn_classifier_kernel(a_ref, agg1_ref, pool_ref, w1_ref, b1_ref,
                          w2_ref, b2_ref, wc_ref, bc_ref, out_ref):
    # One grid step == GB graphs of the batched (block-diagonal) DGL graph, packed
    # block-diagonally into a single dense (NP, NP) adjacency tile (NP = GB * N_PER).
    A = a_ref[...].astype(jnp.float32)                       # (NP, NP), bf16 0/1 -> f32 (exact)

    # GCN layer 1 (in_dim == 1): agg1 = A @ deg precomputed in the wrapper.
    # Rank-1 outer product + bias -> cheap VPU broadcast, then ReLU.
    h1 = jnp.maximum(agg1_ref[...] * w1_ref[...] + b1_ref[...], 0.0)      # (NP, Hp)

    # GCN layer 2: full-K (NP = 128) MXU matmuls with M = GB * N_PER rows.
    agg2 = jnp.dot(A, h1, preferred_element_type=jnp.float32)             # (NP, Hp)
    h2 = jnp.maximum(
        jnp.dot(agg2, w2_ref[...], preferred_element_type=jnp.float32)
        + b2_ref[...], 0.0)                                               # (NP, Hp)

    # dgl.mean_nodes for all GB graphs in one (GB, NP) @ (NP, Hp) MXU matmul.
    # pool rows hold 1/|V_g| in that graph's node slots (0 elsewhere / for pad nodes).
    h_g = jnp.dot(pool_ref[...], h2, preferred_element_type=jnp.float32)  # (GB, Hp)

    # Classifier head -> lane-dense (GB, Cp) unmasked store.
    out_ref[...] = (jnp.dot(h_g, wc_ref[...], preferred_element_type=jnp.float32)
                    + bc_ref[...])                                        # (GB, Cp)


def gcn_classifier(a_blocks, mean_w, w1, b1, w2, b2, wc, bc, graphs_per_step=None):
    """GCN graph classifier over a batch of per-graph adjacency blocks.

    a_blocks: (G, N_PER, N_PER)  dense per-graph adjacency, A[dst, src]
    mean_w:   (G, N_PER)         per-graph mean weights (1/|V_g| for real nodes, 0 pad)
    w1:(1,H) b1:(1,H) w2:(H,H) b2:(1,H) wc:(H,C) bc:(1,C)
    returns:  (G, C) logits
    """
    G, n_per, _ = a_blocks.shape
    hidden = w2.shape[0]
    n_classes = wc.shape[1]

    a_blocks = a_blocks.astype(jnp.float32)
    mean_w = mean_w.astype(jnp.float32)

    # Batch GB graphs per grid step so NP = GB * n_per reaches a full MXU contraction
    # (~128) and amortizes the fixed per-step pipeline overhead.
    if graphs_per_step is None:
        graphs_per_step = max(1, LANE // n_per)
    GB = max(1, min(graphs_per_step, G))
    g_pad = _round_up(G, GB)
    if g_pad != G:
        a_blocks = jnp.pad(a_blocks, ((0, g_pad - G), (0, 0), (0, 0)))
        mean_w = jnp.pad(mean_w, ((0, g_pad - G), (0, 0)))
    num_steps = g_pad // GB
    NP = GB * n_per

    # ---- wrapper-side (XLA) precompute -------------------------------------------
    # Input features = in-degrees; layer-1 aggregation agg1 = A @ deg as batched matvecs.
    deg = jnp.sum(a_blocks, axis=2)                               # (Gp, n_per)
    agg1 = jnp.einsum('gij,gj->gi', a_blocks, deg)                # (Gp, n_per)
    agg1_col = agg1.reshape(num_steps * NP, 1)                    # column per node

    # Block-diagonal pack of GB adjacency blocks -> one dense (NP, NP) tile per step.
    eye = jnp.eye(GB, dtype=jnp.float32)
    a_pack = jnp.einsum('sgij,gh->sgihj',
                        a_blocks.reshape(num_steps, GB, n_per, n_per), eye)
    a_pack = a_pack.reshape(num_steps * NP, NP).astype(jnp.bfloat16)   # 0/1 -> exact in bf16

    # Mean-pool matrix: pool[s*GB+g, g*n_per+i] = mean_w[s*GB+g, i].
    pool = jnp.einsum('sgi,gh->sghi',
                      mean_w.reshape(num_steps, GB, n_per), eye)
    pool = pool.reshape(num_steps * GB, NP)

    # Lane-dense zero padding of the tiny feature dims (exact: padded cols are zeros).
    hp = _round_up(hidden, LANE)
    cp = _round_up(n_classes, LANE)
    w1p = jnp.pad(w1, ((0, 0), (0, hp - hidden)))
    b1p = jnp.pad(b1, ((0, 0), (0, hp - hidden)))
    w2p = jnp.pad(w2, ((0, hp - hidden), (0, hp - hidden)))
    b2p = jnp.pad(b2, ((0, 0), (0, hp - hidden)))
    wcp = jnp.pad(wc, ((0, hp - hidden), (0, cp - n_classes)))
    bcp = jnp.pad(bc, ((0, 0), (0, cp - n_classes)))

    # Scoped-VMEM budget (no double-counting): per-step pipelined blocks are
    # double-buffered, resident weights double-buffer once, plus the f32 working set.
    bf16_b, f32_b = 2, 4
    pipelined_bytes = 2 * (NP * NP * bf16_b        # packed A tile
                           + NP * f32_b            # agg1 column
                           + GB * NP * f32_b       # pool rows
                           + GB * cp * f32_b)      # output block
    resident_bytes = 2 * f32_b * (hp * hp + hp * cp + 3 * hp + cp)       # weights/biases
    working_bytes = f32_b * (NP * NP + 3 * NP * hp + GB * hp)            # A(f32), h1/agg2/h2, h_g
    vmem_limit = int(min(max(pipelined_bytes + resident_bytes + working_bytes
                             + (4 << 20), 16 << 20), 40 << 20))

    const2 = lambda s: (0, 0)
    grid_spec = pltpu.PrefetchScalarGridSpec(
        num_scalar_prefetch=0,
        grid=(num_steps,),
        in_specs=[
            pl.BlockSpec((NP, NP), lambda s: (s, 0)),   # packed block-diag A (bf16)
            pl.BlockSpec((NP, 1), lambda s: (s, 0)),    # agg1 = A @ deg column
            pl.BlockSpec((GB, NP), lambda s: (s, 0)),   # mean-pool rows
            pl.BlockSpec((1, hp), const2),              # W1  (resident)
            pl.BlockSpec((1, hp), const2),              # b1  (resident)
            pl.BlockSpec((hp, hp), const2),             # W2  (resident)
            pl.BlockSpec((1, hp), const2),              # b2  (resident)
            pl.BlockSpec((hp, cp), const2),             # Wc  (resident)
            pl.BlockSpec((1, cp), const2),              # bc  (resident)
        ],
        out_specs=pl.BlockSpec((GB, cp), lambda s: (s, 0)),
    )

    out = pl.pallas_call(
        gcn_classifier_kernel,
        out_shape=jax.ShapeDtypeStruct((g_pad, cp), jnp.float32),
        grid_spec=grid_spec,
        compiler_params=pltpu.CompilerParams(
            dimension_semantics=("parallel",),
            vmem_limit_bytes=vmem_limit,
        ),
    )(a_pack, agg1_col, pool, w1p, b1p, w2p, b2p, wcp, bcp)

    return out[:G, :n_classes]


if __name__ == "__main__":
    # Deterministic problem: G=32 graphs of 8 nodes each -> 2 grid steps of 16 graphs
    # (keeps >=2 parallel steps for v7x's two TensorCores), hidden=32, n_classes=4.
    G, N_PER = 32, 8
    IN_DIM, HIDDEN, N_CLASSES = 1, 32, 4

    key = jax.random.PRNGKey(0)
    k_graph, k_w1, k_b1, k_w2, k_b2, k_wc, k_bc = jax.random.split(key, 7)

    # Per-graph dense adjacency blocks A[dst, src] (the batched DGL graph is
    # block-diagonal; only the blocks are stored, packed in the wrapper).
    a_blocks = jax.random.bernoulli(k_graph, 0.4, (G, N_PER, N_PER)).astype(jnp.float32)

    # dgl.mean_nodes weights: 1/|V_g| per real node (all graphs full-size here).
    mean_w = jnp.full((G, N_PER), 1.0 / N_PER, jnp.float32)

    # Deterministic PyTorch-style Linear init (uniform(-1/sqrt(fan_in), 1/sqrt(fan_in))).
    # Weights stored pre-transposed as (fan_in, fan_out); biases as (1, fan_out).
    def lin_init(kw, kb, fan_in, fan_out):
        bound = 1.0 / np.sqrt(fan_in)
        w = jax.random.uniform(kw, (fan_in, fan_out), jnp.float32, -bound, bound)
        b = jax.random.uniform(kb, (1, fan_out), jnp.float32, -bound, bound)
        return w, b

    w1, b1 = lin_init(k_w1, k_b1, IN_DIM, HIDDEN)
    w2, b2 = lin_init(k_w2, k_b2, HIDDEN, HIDDEN)
    wc, bc = lin_init(k_wc, k_bc, HIDDEN, N_CLASSES)

    out = jax.block_until_ready(
        gcn_classifier(a_blocks, mean_w, w1, b1, w2, b2, wc, bc))

    # Reference: original dense block-diagonal formulation (DGL semantics).
    A_dense = jax.scipy.linalg.block_diag(*[a_blocks[g] for g in range(G)])
    memb = jnp.zeros((G, G * N_PER), jnp.float32)
    for g in range(G):
        memb = memb.at[g, g * N_PER:(g + 1) * N_PER].set(1.0 / N_PER)
    h0 = jnp.sum(A_dense, axis=1, keepdims=True)
    h1 = jax.nn.relu(A_dense @ h0 @ w1 + b1)
    h2 = jax.nn.relu(A_dense @ h1 @ w2 + b2)
    ref = memb @ h2 @ wc + bc

    np.testing.assert_allclose(np.asarray(out), np.asarray(ref), rtol=1e-5, atol=1e-5)

    print("KERNEL_OK")
</pallas_src>

<mosaic_0001>
module attributes {stable_mosaic.version = 11 : i64} {
  func.func @gcn_classifier_kernel(%arg0: i32, %arg1: memref<128x128xbf16, #tpu.memory_space<vmem>>, %arg2: memref<128x1xf32, #tpu.memory_space<vmem>>, %arg3: memref<16x128xf32, #tpu.memory_space<vmem>>, %arg4: memref<1x128xf32, #tpu.memory_space<vmem>>, %arg5: memref<1x128xf32, #tpu.memory_space<vmem>>, %arg6: memref<128x128xf32, #tpu.memory_space<vmem>>, %arg7: memref<1x128xf32, #tpu.memory_space<vmem>>, %arg8: memref<128x128xf32, #tpu.memory_space<vmem>>, %arg9: memref<1x128xf32, #tpu.memory_space<vmem>>, %arg10: memref<16x128xf32, #tpu.memory_space<vmem>>) attributes {dimension_semantics = [#tpu.dimension_semantics<parallel>], iteration_bounds = array<i64: 2>, scalar_prefetch = 0 : i64, scratch_operands = 0 : i64, tpu.core_type = #tpu.core_type<tc>, window_params = [{transform_indices = @transform_0, window_bounds = array<i64: 128, 128>}, {transform_indices = @transform_1, window_bounds = array<i64: 128, 1>}, {transform_indices = @transform_2, window_bounds = array<i64: 16, 128>}, {pipeline_mode = #tpu.pipeline_mode<synchronous>, transform_indices = @transform_3, window_bounds = array<i64: 1, 128>}, {pipeline_mode = #tpu.pipeline_mode<synchronous>, transform_indices = @transform_4, window_bounds = array<i64: 1, 128>}, {pipeline_mode = #tpu.pipeline_mode<synchronous>, transform_indices = @transform_5, window_bounds = array<i64: 128, 128>}, {pipeline_mode = #tpu.pipeline_mode<synchronous>, transform_indices = @transform_6, window_bounds = array<i64: 1, 128>}, {pipeline_mode = #tpu.pipeline_mode<synchronous>, transform_indices = @transform_7, window_bounds = array<i64: 128, 128>}, {pipeline_mode = #tpu.pipeline_mode<synchronous>, transform_indices = @transform_8, window_bounds = array<i64: 1, 128>}, {transform_indices = @transform_9, window_bounds = array<i64: 16, 128>}]} {
    %c0 = arith.constant 0 : index
    %c0_0 = arith.constant 0 : index
    %0 = vector.load %arg1[%c0, %c0_0] : memref<128x128xbf16, #tpu.memory_space<vmem>>, vector<128x128xbf16>
    %1 = arith.extf %0 : vector<128x128xbf16> to vector<128x128xf32>
    %c0_1 = arith.constant 0 : index
    %c0_2 = arith.constant 0 : index
    %2 = vector.load %arg2[%c0_1, %c0_2] : memref<128x1xf32, #tpu.memory_space<vmem>>, vector<128x1xf32>
    %c0_3 = arith.constant 0 : index
    %c0_4 = arith.constant 0 : index
    %3 = vector.load %arg4[%c0_3, %c0_4] : memref<1x128xf32, #tpu.memory_space<vmem>>, vector<1x128xf32>
    %4 = vector.broadcast %2 : vector<128x1xf32> to vector<128x128xf32>
    %5 = vector.broadcast %3 : vector<1x128xf32> to vector<128x128xf32>
    %6 = arith.mulf %4, %5 : vector<128x128xf32>
    %c0_5 = arith.constant 0 : index
    %c0_6 = arith.constant 0 : index
    %7 = vector.load %arg5[%c0_5, %c0_6] : memref<1x128xf32, #tpu.memory_space<vmem>>, vector<1x128xf32>
    %8 = vector.broadcast %7 : vector<1x128xf32> to vector<128x128xf32>
    %9 = arith.addf %6, %8 : vector<128x128xf32>
    %cst = arith.constant 0.000000e+00 : f32
    %10 = vector.broadcast %cst : f32 to vector<128x128xf32>
    %11 = arith.maximumf %9, %10 : vector<128x128xf32>
    %cst_7 = arith.constant dense<0.000000e+00> : vector<128x128xf32>
    %12 = tpu.matmul %1, %11, %cst_7 {dimension_numbers = #tpu.dot_dimension_numbers<[1], [0], [0], [1], [0, 0, 1, 1], [], []>} : vector<128x128xf32>, vector<128x128xf32>, vector<128x128xf32> -> vector<128x128xf32>
    %c0_8 = arith.constant 0 : index
    %c0_9 = arith.constant 0 : index
    %13 = vector.load %arg6[%c0_8, %c0_9] : memref<128x128xf32, #tpu.memory_space<vmem>>, vector<128x128xf32>
    %cst_10 = arith.constant dense<0.000000e+00> : vector<128x128xf32>
    %14 = tpu.matmul %12, %13, %cst_10 {dimension_numbers = #tpu.dot_dimension_numbers<[1], [0], [0], [1], [0, 0, 1, 1], [], []>} : vector<128x128xf32>, vector<128x128xf32>, vector<128x128xf32> -> vector<128x128xf32>
    %c0_11 = arith.constant 0 : index
    %c0_12 = arith.constant 0 : index
    %15 = vector.load %arg7[%c0_11, %c0_12] : memref<1x128xf32, #tpu.memory_space<vmem>>, vector<1x128xf32>
    %16 = vector.broadcast %15 : vector<1x128xf32> to vector<128x128xf32>
    %17 = arith.addf %14, %16 : vector<128x128xf32>
    %cst_13 = arith.constant 0.000000e+00 : f32
    %18 = vector.broadcast %cst_13 : f32 to vector<128x128xf32>
    %19 = arith.maximumf %17, %18 : vector<128x128xf32>
    %c0_14 = arith.constant 0 : index
    %c0_15 = arith.constant 0 : index
    %20 = vector.load %arg3[%c0_14, %c0_15] : memref<16x128xf32, #tpu.memory_space<vmem>>, vector<16x128xf32>
    %cst_16 = arith.constant dense<0.000000e+00> : vector<16x128xf32>
    %21 = tpu.matmul %20, %19, %cst_16 {dimension_numbers = #tpu.dot_dimension_numbers<[1], [0], [0], [1], [0, 0, 1, 1], [], []>} : vector<16x128xf32>, vector<128x128xf32>, vector<16x128xf32> -> vector<16x128xf32>
    %c0_17 = arith.constant 0 : index
    %c0_18 = arith.constant 0 : index
    %22 = vector.load %arg8[%c0_17, %c0_18] : memref<128x128xf32, #tpu.memory_space<vmem>>, vector<128x128xf32>
    %cst_19 = arith.constant dense<0.000000e+00> : vector<16x128xf32>
    %23 = tpu.matmul %21, %22, %cst_19 {dimension_numbers = #tpu.dot_dimension_numbers<[1], [0], [0], [1], [0, 0, 1, 1], [], []>} : vector<16x128xf32>, vector<128x128xf32>, vector<16x128xf32> -> vector<16x128xf32>
    %c0_20 = arith.constant 0 : index
    %c0_21 = arith.constant 0 : index
    %24 = vector.load %arg9[%c0_20, %c0_21] : memref<1x128xf32, #tpu.memory_space<vmem>>, vector<1x128xf32>
    %25 = vector.broadcast %24 : vector<1x128xf32> to vector<16x128xf32>
    %26 = arith.addf %23, %25 : vector<16x128xf32>
    %c0_22 = arith.constant 0 : index
    %c0_23 = arith.constant 0 : index
    %27 = vector.load %arg10[%c0_22, %c0_23] : memref<16x128xf32, #tpu.memory_space<vmem>>, vector<16x128xf32>
    tpu.vector_store %arg10[%c0_22, %c0_23], %26 {strides = array<i32>} : memref<16x128xf32, #tpu.memory_space<vmem>>, vector<16x128xf32>,
    return
  }
  func.func @transform_0(%arg0: i32) -> (i32, i32) {
    %c0_i32 = arith.constant 0 : i32
    %c0_i32_0 = arith.constant 0 : i32
    return %arg0, %c0_i32 : i32, i32
  }
  func.func @transform_1(%arg0: i32) -> (i32, i32) {
    %c0_i32 = arith.constant 0 : i32
    %c0_i32_0 = arith.constant 0 : i32
    return %arg0, %c0_i32 : i32, i32
  }
  func.func @transform_2(%arg0: i32) -> (i32, i32) {
    %c0_i32 = arith.constant 0 : i32
    %c0_i32_0 = arith.constant 0 : i32
    return %arg0, %c0_i32 : i32, i32
  }
  func.func @transform_3(%arg0: i32) -> (i32, i32) {
    %c0_i32 = arith.constant 0 : i32
    %c0_i32_0 = arith.constant 0 : i32
    %c0_i32_1 = arith.constant 0 : i32
    return %c0_i32, %c0_i32_0 : i32, i32
  }
  func.func @transform_4(%arg0: i32) -> (i32, i32) {
    %c0_i32 = arith.constant 0 : i32
    %c0_i32_0 = arith.constant 0 : i32
    %c0_i32_1 = arith.constant 0 : i32
    return %c0_i32, %c0_i32_0 : i32, i32
  }
  func.func @transform_5(%arg0: i32) -> (i32, i32) {
    %c0_i32 = arith.constant 0 : i32
    %c0_i32_0 = arith.constant 0 : i32
    %c0_i32_1 = arith.constant 0 : i32
    return %c0_i32, %c0_i32_0 : i32, i32
  }
  func.func @transform_6(%arg0: i32) -> (i32, i32) {
    %c0_i32 = arith.constant 0 : i32
    %c0_i32_0 = arith.constant 0 : i32
    %c0_i32_1 = arith.constant 0 : i32
    return %c0_i32, %c0_i32_0 : i32, i32
  }
  func.func @transform_7(%arg0: i32) -> (i32, i32) {
    %c0_i32 = arith.constant 0 : i32
    %c0_i32_0 = arith.constant 0 : i32
    %c0_i32_1 = arith.constant 0 : i32
    return %c0_i32, %c0_i32_0 : i32, i32
  }
  func.func @transform_8(%arg0: i32) -> (i32, i32) {
    %c0_i32 = arith.constant 0 : i32
    %c0_i32_0 = arith.constant 0 : i32
    %c0_i32_1 = arith.constant 0 : i32
    return %c0_i32, %c0_i32_0 : i32, i32
  }
  func.func @transform_9(%arg0: i32) -> (i32, i32) {
    %c0_i32 = arith.constant 0 : i32
    %c0_i32_0 = arith.constant 0 : i32
    return %arg0, %c0_i32 : i32, i32
  }
}

</mosaic_0001>

<bundles_post_ra>
// kernel: tpu_custom_call.1
= control target key start
LH: loop header
LB: loop body
LE: loop exit
PB: predicated region body
PF: predicated region fallthrough
CT: control target
= control target key end

     0   :  { %s1610_s0 = inlined_call_operand.vmem [shape: bf16[256,128], index: 0, kind: input, shape index: {}]   ;;  %s1611_s1 = inlined_call_operand.vmem [shape: f32[256,1], index: 1, kind: input, shape index: {}]   ;;  %s1612_s2 = inlined_call_operand.hbm [shape: f32[32,128], index: 2, kind: input, shape index: {}]   ;;  %s1613_s3 = inlined_call_operand.vmem [shape: f32[1,128], index: 3, kind: input, shape index: {}]   ;;  %s1614_s4 = inlined_call_operand.vmem [shape: f32[1,128], index: 4, kind: input, shape index: {}]   ;;  %s1615_s5 = inlined_call_operand.vmem [shape: f32[128,128], index: 5, kind: input, shape index: {}]   ;;  %s1616_s6 = inlined_call_operand.vmem [shape: f32[1,128], index: 6, kind: input, shape index: {}]   ;;  %s1617_s7 = inlined_call_operand.hbm [shape: f32[128,128], index: 7, kind: input, shape index: {}]   ;;  %s1618_s8 = inlined_call_operand.vmem [shape: f32[1,128], index: 8, kind: input, shape index: {}]   ;;  %s1619_s9 = inlined_call_operand.hbm [shape: f32[32,128], index: 9, kind: output, shape index: {}]  }
   0x1   :  { %1623 = sst [smem:[#allocation13_spill]] %s1617_s7 }
   0x2   :  { %14 = vsyncpa [#allocation3], 0 }
   0x3   :  { %16 = vsyncpa [#allocation3 + $0x1], 0 }
   0x4   :  { %17 = vsyncpa [#allocation6], 0 }
   0x5   :  { %18 = vsyncpa [#allocation4], 0 }
   0x6   :  { %20 = vsyncpa [#allocation4 + $0x1], 0  ;;  %s1309_s30 = smov 0   ;;  %s1311_s10 = smov 0  }
   0x7   :  { %s1313_s11 = smov 0   ;;  %s1315_s12 = smov 0  }
   0x8 LB: > { %1624 = sst [smem:[#allocation11_spill]] %s1247_s11  ;;  %s1330_s13 = sadd.s32 4294967295, %s1251_s12   ;;  %s1251_s12 = sphi %s1315_s12, %s1639_s12   ;;  %s1247_s11 = sphi %s1313_s11, %s1636_s11   ;;  %s1243_s10 = sphi %s1311_s10, %s1638_s10   ;;  %s1239_s30 = sphi %s1309_s30, %s1637_s30  }
   0x9   : > { %s959_s14 = sadd.s32 4294967294, %s1251_s12   ;;  %p98_p0 = scmp.ne.s32.totalorder %s1243_s10, %s1239_s30 }
   0xa   : > { %p99_p1 = scmp.eq.s32.totalorder %s1330_s13, 0  ;;  %p248_p2 = scmp.eq.s32.totalorder %s1330_s13, 1 }
   0xb   : > { %p254_p3 = scmp.eq.s32.totalorder %s959_s14, 1  ;;  %p960_p5 = scmp.ge.s32.totalorder %s1251_s12, 1 }
   0xc   : > { %p1339_p4 = por %p99_p1, %p98_p0  ;;  %p261_p7 = scmp.lt.s32.totalorder %s1251_s12, 3 }
   0xd   : > { %p1344_p6 = por %p254_p3, %p98_p0  ;;  %s1627_s7 = sld [smem:[#allocation13_spill]] }
   0xe   : > { %p1352_p8 = pnand %p960_p5, %p261_p7  ;;  %s1253_s21 = smov [#allocation5]  }
   0xf   : > { %s286_s22 = sshll.u32 %s1253_s21, 4  ;;  %s1362_s23 = sadd.s32 1, %s1251_s12   ;;  %s287_s22 = int_to_ptr.vmem [resolvable:$true] %s286_s22 }
  0x10   : > { %p1060_p9 = pneg %p1352_p8  ;;  %s1620_s24 = smov 128  }
  0x11   : > { %s1621_s25 = smov 8   ;;  %s82_s26 = ssub.s32 %s1251_s12, %s1362_s23 }
  0x12   : > { %p1061_p10 = pnand %p1060_p9, %p99_p1  ;;  %s85_s27 = sadd.s32 1, %s1247_s11 }
  0x13   : > { %s284_s19 = sshll.u32 %s1627_s7, 4  ;;  %p83_p12 = scmp.eq.s32.totalorder %s82_s26, 0  ;;  %s285_s19 = int_to_ptr.hbm [resolvable:$true] %s284_s19 }
  0x14   : > { %1063 = dma.hbm_to_vmem [thread:$0]  (!%p1061_p10), %s285_s19, 2048, %s287_s22, [#allocation6], %s1620_s24, %s1620_s24, %s1621_s25  }
  0x15   : > { %p92_p13 = scmp.ne.s32.totalorder %s1247_s11, %s1243_s10  ;;  %p93_p0 = scmp.eq.s32.totalorder %s1251_s12, 0 }
  0x16   : > { %s1374_s28 = scalar_select %p83_p12, %s1247_s11, %s85_s27  }
  0x17   : > { %p1378_p3 = por %p248_p2, %p92_p13  ;;  %p1073_p5 = scmp.lt.s32.totalorder %s1251_s12, 2 }
  0x18   : > { %1629 = sst [smem:[#allocation12_spill]] %s1374_s28  ;;  %s321_s14 = sand.u32 1, %s1247_s11  }
  0x19   : > { %s979_s17 = sshll.u32 %s1251_s12, 4  ;;  %p94_p7 = por %p93_p0, %p92_p13 }
  0x1a   : > { %s963_s18 = sshll.u32 %s321_s14, 4  ;;  %s330_s19 = scalar_lea.hbm %s1612_s2, %s979_s17 }
  0x1b   : > { %s331_s22 = sshll.u32 %s330_s19, 4  ;;  %s325_s26 = scalar_lea.vmem [#allocation2], %s963_s18  ;;  %s332_s22 = int_to_ptr.hbm [resolvable:$true] %s331_s22 }
  0x1c   : > { %s333_s24 = sshll.u32 %s325_s26, 4  ;;  %p1388_p9 = pnand %p1073_p5, %p94_p7  ;;  %s334_s24 = int_to_ptr.vmem [resolvable:$true] %s333_s24 }
  0x1d   : > { %s322_s25 = scalar_lea.sflag [#allocation3], %s321_s14  ;;  %s1151_s28 = sshra.s32 %s332_s22, 4  ;;  %s1152_s28 = int_to_ptr.hbm [resolvable:$true] %s1151_s28 }
  0x1e   : > { %s1153_s11 = scalar_lea.hbm %s1152_s28, 16  ;;  %p1155_p10 = pneg %p1388_p9 }
  0x1f   : > { %p1154_p2 = scmp.ne.s32.totalorder %s1152_s28, %s1153_s11  ;;  %s1158_s18 = scalar_lea.hbm %s1612_s2, 32 }
  0x20   : > { %p1159_p0 = scmp.lt.s32.totalorder %s1152_s28, %s1612_s2  ;;  %p1160_p5 = scmp.lt.s32.totalorder %s1158_s18, %s1153_s11 }
  0x21   : > { %p1156_p12 = pnand %p1155_p10, %p1154_p2 }
  0x22   : > { %p1161_p7 = por %p1160_p5, %p1159_p0 }
  0x23   : > { %p1157_p13 = pneg %p1156_p12 }
  0x25   : > { %p1162_p11 = pnand %p1161_p7, %p1157_p13 }
  0x27   : > { %1165 = shalt.err (!%p1162_p11)
}
  0x28   : > { %s1632_s14 = smov 8   ;;  %s1633_s26 = smov 128  }
  0x29   : > { %1067 = dma.hbm_to_vmem [thread:$0]  (!%p1388_p9), %s332_s22, 256, %s334_s24, %s322_s25, %s1633_s26, %s1633_s26, %s1632_s14  }
  0x2a   : > { %345 = sbr.rel (%p1352_p8) target bundleno = 845 (0x34d), region = 56  ;;  %s1408_s7 = sand.u32 (!%p1352_p8), 1, %s1243_s10  }
  0x2b   : > { %s967_s11 = sshll.u32 (!%p1352_p8), %s1408_s7, 4  ;;  %s348_s28 = scalar_lea.sflag (!%p1352_p8), [#allocation3], %s1408_s7 }
  0x2c   : > { %s1414_s17 = scalar_lea.vmem (!%p1352_p8), [#allocation2], %s967_s11 }
  0x2f   : > { %1226 = dma.done.wait (%p1339_p4), %s348_s28, 256  }
  0x30   : > { %1228 = vsyncadd (%p1339_p4), %s348_s28, 4294967040 }
  0x31   : > { %1230 = dma.done.wait (%p99_p1), [#allocation6], 2048  }
  0x32   : > { %1232 = vsyncadd (%p99_p1), [#allocation6], 4294965248  ;;  %s1425_s20 = sshll.u32 %s1330_s13, 4  ;;  %v1256_v0 = vmov 0   ;;  %v1456_v18 = vld [vmem:[%s1613_s3] ss:$0 sm:$0xff] }
  0x33   : > { %1116 = vset.pattern.permute.xlu2 %v1256_v0  ;;  %1115 = vset.pattern.permute.xlu1 %v1256_v0  ;;  %p403_p8 = scmp.lt.s32.totalorder %s1425_s20, 31  ;;  %v1461_v20 = vld [vmem:[%s1614_s4] ss:$0 sm:$0xff]  ;;  %s837_s21 = scalar_lea.sflag [#allocation4], %s1408_s7 }
  0x34   : > { %1114 = vset.pattern.permute.xlu0 %v1256_v0 }
  0x35   : > { %s1429_s24 = scalar_select %p403_p8, %s1425_s20, 31 }
  0x37   : > { %s973_s15 = sshll.u32 %s1429_s24, 3  ;;  %s971_s14 = sshll.u32 %s1429_s24, 2 }
  0x38   : > { %s1435_s27 = scalar_lea.vmem %s1611_s1, %s973_s15  ;;  %s1497_s15 = scalar_lea.vmem %s1610_s0, %s971_s14 }
  0x39   : > { %v463_v1 = vld [vmem:[%s1435_s27 + $0x78] sm:$0xff]  ;;  %v461_v2 = vld [vmem:[%s1435_s27 + $0x68] sm:$0xff]  ;;  %v462_v4 = vld [vmem:[%s1435_s27 + $0x70] sm:$0xff] }
  0x3a   : > { %v459_v3 = vld [vmem:[%s1435_s27 + $0x58] sm:$0xff]  ;;  %542 = vperm.xlu0 %1114, %v463_v1   ;;  %532 = vperm.xlu1 %1115, %v461_v2   ;;  %v460_v5 = vld [vmem:[%s1435_s27 + $0x60] sm:$0xff]  ;;  %v458_v6 = vld [vmem:[%s1435_s27 + $0x50] sm:$0xff] }
  0x3b   : > { %522 = vperm.xlu2 %1116, %v459_v3   ;;  %v457_v7 = vld [vmem:[%s1435_s27 + $0x48] sm:$0xff]  ;;  %v456_v8 = vld [vmem:[%s1435_s27 + $0x40] sm:$0xff]  ;;  %v455_v9 = vld [vmem:[%s1435_s27 + $0x38] sm:$0xff] }
  0x3c   : > { %v454_v10 = vld [vmem:[%s1435_s27 + $0x30] sm:$0xff]  ;;  %v453_v11 = vld [vmem:[%s1435_s27 + $0x28] sm:$0xff]  ;;  %v452_v12 = vld [vmem:[%s1435_s27 + $0x20] sm:$0xff] }
  0x3d   : > { %v451_v13 = vld [vmem:[%s1435_s27 + $0x18] sm:$0xff]  ;;  %v450_v14 = vld [vmem:[%s1435_s27 + $0x10] sm:$0xff]  ;;  %v449_v15 = vld [vmem:[%s1435_s27 + $0x8] sm:$0xff] }
  0x3e   : > { %v448_v16 = vld [vmem:[%s1435_s27] sm:$0xff]  ;;  %s848_s27 = scalar_lea.hbm %s1619_s9, %s1425_s20 }
  0x3f   : > { %s851_s18 = sshll.u32 %s848_s27, 4  ;;  %s852_s18 = int_to_ptr.hbm [resolvable:$true] %s851_s18 }
  0x42   : > { %537 = vperm.xlu0 %1114, %v462_v4   ;;  %527 = vperm.xlu1 %1115, %v460_v5  }
  0x43   : > { %517 = vperm.xlu2 %1116, %v458_v6  }
  0x4a   : > { %512 = vperm.xlu0 %1114, %v457_v7   ;;  %507 = vperm.xlu1 %1115, %v456_v8  }
  0x4b   : > { %502 = vperm.xlu2 %1116, %v455_v9  }
  0x52   : > { %497 = vperm.xlu0 %1114, %v454_v10   ;;  %492 = vperm.xlu1 %1115, %v453_v11  }
  0x53   : > { %487 = vperm.xlu2 %1116, %v452_v12  }
  0x5a   : > { %482 = vperm.xlu0 %1114, %v451_v13   ;;  %477 = vperm.xlu1 %1115, %v450_v14  }
  0x5b   : > { %472 = vperm.xlu2 %1116, %v449_v15  }
  0x62   : > { %467 = vperm.xlu0 %1114, %v448_v16  }
  0x95   : > { %v523_v17 = vpop.permute.xlu2 %522 }
  0x96   : > { %v559_v32 = vmul.f32 %v1456_v18, %v523_v17  ;;  %v1501_v17 = vld [vmem:[%s1497_s15 + $0x20] sm:$0xff]  }
  0x98   : > { %v579_v39 = vadd.f32 %v1461_v20, %v559_v32  ;;  %v1014_v32 = vld [vmem:[%s1497_s15 + $0x10] sm:$0xff]  }
  0x9a   : > { %v595_v47 = vmax.f32 %v579_v39, 0.0 }
  0x9d   : > { %v518_v19 = vpop.permute.xlu2 %517 }
  0x9e   : > { %v558_v35 = vmul.f32 %v1456_v18, %v518_v19  ;;  %v982_v19 = vld [vmem:[%s1497_s15] sm:$0xff]  }
  0xa0   : > { %v578_v45 = vadd.f32 %v1461_v20, %v558_v35  ;;  %v680_v35 = vld [vmem:[%s1615_s5 + $0x78] sm:$0xff] }
  0xa1   : > { %1036 = vmatpush.msra.mxu3 %v680_v35  ;;  %685 = vmatpush.msra.mxu1 %v680_v35 }
  0xa2   : > { %v594_v50 = vmax.f32 %v578_v45, 0.0  ;;  %v674_v45 = vld [vmem:[%s1615_s5 + $0x48] sm:$0xff] }
  0xa5   : > { %v503_v31 = vpop.permute.xlu2 %502 }
  0xa6   : > { %v555_v46 = vmul.f32 %v1456_v18, %v503_v31 }
  0xa8   : > { %v575_v53 = vadd.f32 %v1461_v20, %v555_v46 }
  0xaa   : > { %v591_v60 = vmax.f32 %v575_v53, 0.0  ;;  %v669_v53 = vld [vmem:[%s1615_s5 + $0x20] sm:$0xff] }
  0xac   : > { %v543_v21 = vpop.permute.xlu0 %542  ;;  %v533_v22 = vpop.permute.xlu1 %532 }
  0xad   : > { %v563_v23 = vmul.f32 %v1456_v18, %v543_v21  ;;  %v561_v26 = vmul.f32 %v1456_v18, %v533_v22  ;;  %v488_v49 = vpop.permute.xlu2 %487  ;;  %v1000_v22 = vunpack.c.h.bf16 %v1501_v17 }
  0xae   : > { %v552_v56 = vmul.f32 %v1456_v18, %v488_v49  ;;  %v672_v49 = vld [vmem:[%s1615_s5 + $0x38] sm:$0xff] }
  0xaf   : > { %v583_v24 = vadd.f32 %v1461_v20, %v563_v23  ;;  %v581_v34 = vadd.f32 %v1461_v20, %v561_v26  ;;  %v983_v23 = vunpack.c.l.bf16 %v982_v19  ;;  %v984_v26 = vunpack.c.h.bf16 %v982_v19 }
  0xb0   : > { %v572_v0 = vadd.f32 %v1461_v20, %v552_v56  ;;  %v666_v56 = vld [vmem:[%s1615_s5 + $0x8] sm:$0xff] }
  0xb1   : > { %v599_v25 = vmax.f32 %v583_v24, 0.0  ;;  %v597_v38 = vmax.f32 %v581_v34, 0.0  ;;  %v991_v34 = vunpack.c.l.bf16 %v1014_v32 }
  0xb2   : > { %v588_v8 = vmax.f32 %v572_v0, 0.0 }
  0xb3   : > { %600 = vmatpush.msra.mxu0 %v599_v25  ;;  %1020 = vmatpush.msra.mxu2 %v599_v25 }
  0xb4   : > { %v538_v27 = vpop.permute.xlu0 %537  ;;  %v528_v28 = vpop.permute.xlu1 %527 }
  0xb5   : > { %v562_v29 = vmul.f32 %v1456_v18, %v538_v27  ;;  %v560_v30 = vmul.f32 %v1456_v18, %v528_v28  ;;  %v473_v1 = vpop.permute.xlu2 %472  ;;  %v1013_v27 = vld [vmem:[%s1497_s15 + $0x8] sm:$0xff]  }
  0xb6   : > { %v549_v5 = vmul.f32 %v1456_v18, %v473_v1  ;;  %v988_v31 = vunpack.c.h.bf16 %v1013_v27 }
  0xb7   : > { %v582_v33 = vadd.f32 %v1461_v20, %v562_v29  ;;  %v580_v37 = vadd.f32 %v1461_v20, %v560_v30  ;;  %v987_v29 = vunpack.c.l.bf16 %v1013_v27 }
  0xb8   : > { %v569_v12 = vadd.f32 %v1461_v20, %v549_v5 }
  0xb9   : > { %v598_v36 = vmax.f32 %v582_v33, 0.0  ;;  %v596_v44 = vmax.f32 %v580_v37, 0.0  ;;  %v1019_v37 = vld [vmem:[%s1497_s15 + $0x38] sm:$0xff]  }
  0xba   : > { %v585_v16 = vmax.f32 %v569_v12, 0.0  ;;  %v1011_v39 = vunpack.c.l.bf16 %v1019_v37  ;;  %v1012_v46 = vunpack.c.h.bf16 %v1019_v37 }
  0xbb   : > { %601 = vmatpush.msra.mxu0 %v598_v36  ;;  %1021 = vmatpush.msra.mxu2 %v598_v36  ;;  %v679_v36 = vld [vmem:[%s1615_s5 + $0x70] sm:$0xff] }
  0xbc   : > { %v513_v40 = vpop.permute.xlu0 %512  ;;  %v508_v41 = vpop.permute.xlu1 %507  ;;  %1037 = vmatpush.msra.mxu3 %v679_v36  ;;  %686 = vmatpush.msra.mxu1 %v679_v36 }
  0xbd   : > { %v557_v42 = vmul.f32 %v1456_v18, %v513_v40  ;;  %v556_v43 = vmul.f32 %v1456_v18, %v508_v41  ;;  %602 = vmatpush.msra.mxu0 %v597_v38  ;;  %1022 = vmatpush.msra.mxu2 %v597_v38  ;;  %v678_v38 = vld [vmem:[%s1615_s5 + $0x68] sm:$0xff]  ;;  %v992_v40 = vunpack.c.h.bf16 %v1014_v32  ;;  %v677_v41 = vld [vmem:[%s1615_s5 + $0x60] sm:$0xff] }
  0xbe   : > { %1038 = vmatpush.msra.mxu3 %v678_v38  ;;  %687 = vmatpush.msra.mxu1 %v678_v38 }
  0xbf   : > { %603 = vmatpush.msra.mxu0 %v596_v44  ;;  %1023 = vmatpush.msra.mxu2 %v596_v44  ;;  %v577_v48 = vadd.f32 %v1461_v20, %v557_v42  ;;  %v576_v51 = vadd.f32 %v1461_v20, %v556_v43  ;;  %v676_v42 = vld [vmem:[%s1615_s5 + $0x58] sm:$0xff]  ;;  %v675_v43 = vld [vmem:[%s1615_s5 + $0x50] sm:$0xff] }
  0xc0   : > { %1039 = vmatpush.msra.mxu3 %v677_v41  ;;  %688 = vmatpush.msra.mxu1 %v677_v41  ;;  %v1015_v44 = vld [vmem:[%s1497_s15 + $0x18] sm:$0xff]  }
  0xc1   : > { %604 = vmatpush.msra.mxu0 %v595_v47  ;;  %1024 = vmatpush.msra.mxu2 %v595_v47  ;;  %v593_v52 = vmax.f32 %v577_v48, 0.0  ;;  %v592_v59 = vmax.f32 %v576_v51, 0.0  ;;  %v995_v47 = vunpack.c.l.bf16 %v1015_v44  ;;  %v673_v48 = vld [vmem:[%s1615_s5 + $0x40] sm:$0xff]  ;;  %v670_v51 = vld [vmem:[%s1615_s5 + $0x28] sm:$0xff]  ;;  %v806_v41 = vld [vmem:[#allocation5 + $0x78] sm:$0xff] }
  0xc2   : > { %1040 = vmatpush.msra.mxu3 %v676_v42  ;;  %689 = vmatpush.msra.mxu1 %v676_v42  ;;  %v805_v42 = vld [vmem:[#allocation5 + $0x70] sm:$0xff] }
  0xc3   : > { %605 = vmatpush.msra.mxu0 %v594_v50  ;;  %1025 = vmatpush.msra.mxu2 %v594_v50  ;;  %v671_v50 = vld [vmem:[%s1615_s5 + $0x30] sm:$0xff] }
  0xc4   : > { %v498_v54 = vpop.permute.xlu0 %497  ;;  %v493_v55 = vpop.permute.xlu1 %492  ;;  %1041 = vmatpush.msra.mxu3 %v675_v43  ;;  %690 = vmatpush.msra.mxu1 %v675_v43 }
  0xc5   : > { %v554_v57 = vmul.f32 %v1456_v18, %v498_v54  ;;  %v553_v58 = vmul.f32 %v1456_v18, %v493_v55  ;;  %606 = vmatpush.msra.mxu0 %v593_v52  ;;  %1026 = vmatpush.msra.mxu2 %v593_v52  ;;  %v996_v52 = vunpack.c.h.bf16 %v1015_v44  ;;  %v668_v54 = vld [vmem:[%s1615_s5 + $0x18] sm:$0xff]  ;;  %v667_v55 = vld [vmem:[%s1615_s5 + $0x10] sm:$0xff]  ;;  %v804_v44 = vld [vmem:[#allocation5 + $0x68] sm:$0xff] }
  0xc6   : > { %1042 = vmatpush.msra.mxu3 %v674_v45  ;;  %691 = vmatpush.msra.mxu1 %v674_v45 }
  0xc7   : > { %607 = vmatpush.msra.mxu0 %v592_v59  ;;  %1027 = vmatpush.msra.mxu2 %v592_v59  ;;  %v574_v61 = vadd.f32 %v1461_v20, %v554_v57  ;;  %v573_v62 = vadd.f32 %v1461_v20, %v553_v58  ;;  %v999_v57 = vunpack.c.l.bf16 %v1501_v17  ;;  %v665_v58 = vld [vmem:[%s1615_s5] sm:$0xff] }
  0xc8   : > { %1043 = vmatpush.msra.mxu3 %v673_v48  ;;  %692 = vmatpush.msra.mxu1 %v673_v48  ;;  %v803_v48 = vld [vmem:[#allocation5 + $0x60] sm:$0xff] }
  0xc9   : > { %608 = vmatpush.msra.mxu0 %v591_v60  ;;  %1028 = vmatpush.msra.mxu2 %v591_v60  ;;  %v590_v63 = vmax.f32 %v574_v61, 0.0  ;;  %v589_v2 = vmax.f32 %v573_v62, 0.0 }
  0xca   : > { %1044 = vmatpush.msra.mxu3 %v672_v49  ;;  %693 = vmatpush.msra.mxu1 %v672_v49 }
  0xcb   : > { %609 = vmatpush.msra.mxu0 %v590_v63  ;;  %1029 = vmatpush.msra.mxu2 %v590_v63 }
  0xcc   : > { %v483_v3 = vpop.permute.xlu0 %482  ;;  %v478_v4 = vpop.permute.xlu1 %477  ;;  %1045 = vmatpush.msra.mxu3 %v671_v50  ;;  %694 = vmatpush.msra.mxu1 %v671_v50  ;;  %v802_v50 = vld [vmem:[#allocation5 + $0x58] sm:$0xff] }
  0xcd   : > { %v551_v6 = vmul.f32 %v1456_v18, %v483_v3  ;;  %v550_v7 = vmul.f32 %v1456_v18, %v478_v4  ;;  %610 = vmatpush.msra.mxu0 %v589_v2  ;;  %1030 = vmatpush.msra.mxu2 %v589_v2 }
  0xce   : > { %1046 = vmatpush.msra.mxu3 %v670_v51  ;;  %695 = vmatpush.msra.mxu1 %v670_v51 }
  0xcf   : > { %611 = vmatpush.msra.mxu0 %v588_v8  ;;  %1031 = vmatpush.msra.mxu2 %v588_v8  ;;  %v571_v9 = vadd.f32 %v1461_v20, %v551_v6  ;;  %v570_v10 = vadd.f32 %v1461_v20, %v550_v7 }
  0xd0   : > { %1047 = vmatpush.msra.mxu3 %v669_v53  ;;  %696 = vmatpush.msra.mxu1 %v669_v53  ;;  %v801_v53 = vld [vmem:[#allocation5 + $0x50] sm:$0xff] }
  0xd1   : > { %v587_v11 = vmax.f32 %v571_v9, 0.0  ;;  %v586_v13 = vmax.f32 %v570_v10, 0.0 }
  0xd2   : > { %1048 = vmatpush.msra.mxu3 %v668_v54  ;;  %697 = vmatpush.msra.mxu1 %v668_v54 }
  0xd3   : > { %612 = vmatpush.msra.mxu0 %v587_v11  ;;  %1032 = vmatpush.msra.mxu2 %v587_v11 }
  0xd4   : > { %v468_v14 = vpop.permute.xlu0 %467  ;;  %1049 = vmatpush.msra.mxu3 %v667_v55  ;;  %698 = vmatpush.msra.mxu1 %v667_v55 }
  0xd5   : > { %v548_v15 = vmul.f32 %v1456_v18, %v468_v14  ;;  %613 = vmatpush.msra.mxu0 %v586_v13  ;;  %1033 = vmatpush.msra.mxu2 %v586_v13  ;;  %v1017_v18 = vld [vmem:[%s1497_s15 + $0x28] sm:$0xff]  }
  0xd6   : > { %v1003_v25 = vunpack.c.l.bf16 %v1017_v18  ;;  %v1004_v28 = vunpack.c.h.bf16 %v1017_v18  ;;  %1050 = vmatpush.msra.mxu3 %v666_v56  ;;  %699 = vmatpush.msra.mxu1 %v666_v56  ;;  %v800_v56 = vld [vmem:[#allocation5 + $0x48] sm:$0xff] }
  0xd7   : > { %614 = vmatpush.msra.mxu0 %v585_v16  ;;  %1034 = vmatpush.msra.mxu2 %v585_v16  ;;  %v568_v21 = vadd.f32 %v1461_v20, %v548_v15  ;;  %v1018_v20 = vld [vmem:[%s1497_s15 + $0x30] sm:$0xff]   ;;  %s1195_s15 = sshra.s32 %s852_s18, 4  ;;  %s1196_s15 = int_to_ptr.hbm [resolvable:$true] %s1195_s15 }
  0xd8   : > { %v1007_v30 = vunpack.c.l.bf16 %v1018_v20  ;;  %v1008_v33 = vunpack.c.h.bf16 %v1018_v20  ;;  %1051 = vmatpush.msra.mxu3 %v665_v58  ;;  %700 = vmatpush.msra.mxu1 %v665_v58  ;;  %s1197_s19 = scalar_lea.hbm %s1196_s15, 16  ;;  %p1202_p9 = scmp.lt.s32.totalorder %s1196_s15, %s1619_s9 }
  0xd9   : > { %v584_v24 = vmax.f32 %v568_v21, 0.0  ;;  %p1198_p1 = scmp.ne.s32.totalorder %s1196_s15, %s1197_s19 }
  0xda   : > { %811 = vmatpush.msrb.mxu3 %v806_v41 }
  0xdb   : > { %615 = vmatpush.msra.mxu0 %v584_v24  ;;  %1035 = vmatpush.msra.mxu2 %v584_v24  ;;  %p1199_p4 = pnand %p1198_p1, %p1378_p3 }
  0xdc   : > { %643 = vmatmul.f32.vlgmr.msra.gmra.mxu2 %v1000_v22  ;;  %616 = vmatmul.f32.vlgmr.msra.gmra.mxu0 %v983_v23 }
  0xdd   : > { %812 = vmatpush.msrb.mxu3 %v805_v42  ;;  %p1200_p11 = pneg %p1199_p4 }
  0xdf   : > { %813 = vmatpush.msrb.mxu3 %v804_v44 }
  0xe1   : > { %814 = vmatpush.msrb.mxu3 %v803_v48 }
  0xe3   : > { %815 = vmatpush.msrb.mxu3 %v802_v50 }
  0xe4   : > { %646 = vmatmul.f32.gmra.mxu2 %v1003_v25  ;;  %619 = vmatmul.f32.gmra.mxu0 %v984_v26  ;;  %v1119_v26 = vld [vmem:[%s1616_s6] ss:$0 sm:$0xff] }
  0xe5   : > { %816 = vmatpush.msrb.mxu3 %v801_v53 }
  0xe7   : > { %817 = vmatpush.msrb.mxu3 %v800_v56 }
  0xec   : > { %649 = vmatmul.f32.gmra.mxu2 %v1004_v28  ;;  %622 = vmatmul.f32.gmra.mxu0 %v987_v29 }
  0xf4   : > { %652 = vmatmul.f32.gmra.mxu2 %v1007_v30  ;;  %625 = vmatmul.f32.gmra.mxu0 %v988_v31 }
  0xfc   : > { %655 = vmatmul.f32.gmra.mxu2 %v1008_v33  ;;  %628 = vmatmul.f32.gmra.mxu0 %v991_v34 }
 0x104   : > { %658 = vmatmul.f32.gmra.mxu2 %v1011_v39  ;;  %631 = vmatmul.f32.gmra.mxu0 %v992_v40 }
 0x10c   : > { %661 = vmatmul.f32.gmra.mxu2 %v1012_v46  ;;  %634 = vmatmul.f32.gmra.mxu0 %v995_v47 }
 0x114   : > { %637 = vmatmul.f32.gmra.mxu0 %v996_v52 }
 0x11c   : > { %640 = vmatmul.f32.gmra.mxu0 %v999_v57 }
 0x159   : > { %v617_v59 = vpop.f32.mrf.mxu0 }
 0x15a   : > { %701 = vmatmul.f32.vlgmr.msra.gmra.mxu1 %v617_v59  ;;  %v799_v59 = vld [vmem:[#allocation5 + $0x40] sm:$0xff] }
 0x15b   : > { %818 = vmatpush.msrb.mxu3 %v799_v59 }
 0x15f   : > { %v644_v60 = vpop.f32.mrf.mxu2 }
 0x160   : > { %728 = vmatmul.f32.vlgmr.msra.gmra.mxu3 %v644_v60 }
 0x161   : > { %v620_v61 = vpop.f32.mrf.mxu0 }
 0x162   : > { %704 = vmatmul.f32.gmra.mxu1 %v620_v61 }
 0x167   : > { %v647_v62 = vpop.f32.mrf.mxu2 }
 0x168   : > { %731 = vmatmul.f32.gmra.mxu3 %v647_v62  ;;  %v798_v62 = vld [vmem:[#allocation5 + $0x38] sm:$0xff] }
 0x169   : > { %v623_v63 = vpop.f32.mrf.mxu0  ;;  %819 = vmatpush.msrb.mxu3 %v798_v62 }
 0x16a   : > { %707 = vmatmul.f32.gmra.mxu1 %v623_v63 }
 0x16f   : > { %v650_v0 = vpop.f32.mrf.mxu2 }
 0x170   : > { %734 = vmatmul.f32.gmra.mxu3 %v650_v0 }
 0x171   : > { %v626_v1 = vpop.f32.mrf.mxu0 }
 0x172   : > { %710 = vmatmul.f32.gmra.mxu1 %v626_v1  ;;  %v797_v1 = vld [vmem:[#allocation5 + $0x30] sm:$0xff] }
 0x173   : > { %820 = vmatpush.msrb.mxu3 %v797_v1 }
 0x177   : > { %v653_v2 = vpop.f32.mrf.mxu2 }
 0x178   : > { %737 = vmatmul.f32.gmra.mxu3 %v653_v2 }
 0x179   : > { %v629_v3 = vpop.f32.mrf.mxu0 }
 0x17a   : > { %713 = vmatmul.f32.gmra.mxu1 %v629_v3 }
 0x17f   : > { %v656_v4 = vpop.f32.mrf.mxu2 }
 0x180   : > { %740 = vmatmul.f32.gmra.mxu3 %v656_v4  ;;  %v796_v4 = vld [vmem:[#allocation5 + $0x28] sm:$0xff] }
 0x181   : > { %v632_v5 = vpop.f32.mrf.mxu0  ;;  %821 = vmatpush.msrb.mxu3 %v796_v4 }
 0x182   : > { %716 = vmatmul.f32.gmra.mxu1 %v632_v5 }
 0x187   : > { %v659_v6 = vpop.f32.mrf.mxu2 }
 0x188   : > { %743 = vmatmul.f32.gmra.mxu3 %v659_v6  ;;  %v795_v6 = vld [vmem:[#allocation5 + $0x20] sm:$0xff] }
 0x189   : > { %v635_v7 = vpop.f32.mrf.mxu0  ;;  %822 = vmatpush.msrb.mxu3 %v795_v6 }
 0x18a   : > { %719 = vmatmul.f32.gmra.mxu1 %v635_v7 }
 0x18f   : > { %v662_v8 = vpop.f32.mrf.mxu2 }
 0x190   : > { %746 = vmatmul.f32.gmra.mxu3 %v662_v8  ;;  %v766_v8 = vld [vmem:[%s1414_s17] sm:$0xff] }
 0x191   : > { %v638_v9 = vpop.f32.mrf.mxu0 }
 0x192   : > { %722 = vmatmul.f32.gmra.mxu1 %v638_v9  ;;  %v794_v9 = vld [vmem:[#allocation5 + $0x18] sm:$0xff] }
 0x193   : > { %823 = vmatpush.msrb.mxu3 %v794_v9 }
 0x199   : > { %v641_v10 = vpop.f32.mrf.mxu0 }
 0x19a   : > { %725 = vmatmul.f32.gmra.mxu1 %v641_v10  ;;  %v793_v10 = vld [vmem:[#allocation5 + $0x10] sm:$0xff] }
 0x19b   : > { %824 = vmatpush.msrb.mxu3 %v793_v10 }
 0x1d7   : > { %v1561_v11 = vpop.f32.mrf.mxu1 }
 0x1d8   : > { %v703_v2 = vadd.f32 %v1119_v26, %v1561_v11  ;;  %v792_v11 = vld [vmem:[#allocation5 + $0x8] sm:$0xff] }
 0x1d9   : > { %825 = vmatpush.msrb.mxu3 %v792_v11 }
 0x1da   : > { %v750_v7 = vmax.f32 %v703_v2, 0.0 }
 0x1df   : > { %v1563_v12 = vpop.f32.mrf.mxu1 }
 0x1e0   : > { %v706_v63 = vadd.f32 %v1119_v26, %v1563_v12  ;;  %v791_v12 = vld [vmem:[#allocation5] sm:$0xff] }
 0x1e1   : > { %826 = vmatpush.msrb.mxu3 %v791_v12 }
 0x1e2   : > { %v751_v5 = vmax.f32 %v706_v63, 0.0 }
 0x1e3   : > { %v729_v13 = vpop.f32.mrf.mxu3 }
 0x1e4   : > { %v730_v38 = vadd.f32 %v1119_v26, %v729_v13  ;;  %v767_v13 = vld [vmem:[%s1414_s17 + $0x8] sm:$0xff]  ;;  %s401_s17 = scalar_lea.vmem [#allocation7], %s967_s11  ;;  %s1201_s11 = scalar_lea.hbm %s1619_s9, 32 }
 0x1e5   : > { %s849_s13 = sshll.u32 %s401_s17, 4  ;;  %p1203_p2 = scmp.lt.s32.totalorder %s1201_s11, %s1197_s19  ;;  %s850_s13 = int_to_ptr.vmem [resolvable:$true] %s849_s13 }
 0x1e6   : > { %v759_v45 = vmax.f32 %v730_v38, 0.0 }
 0x1e7   : > { %v708_v14 = vpop.f32.mrf.mxu1  ;;  %p1204_p10 = por %p1203_p2, %p1202_p9 }
 0x1e8   : > { %v709_v60 = vadd.f32 %v1119_v26, %v708_v14 }
 0x1e9   : > { %p1205_p12 = pnand %p1204_p10, %p1200_p11 }
 0x1ea   : > { %v752_v3 = vmax.f32 %v709_v60, 0.0 }
 0x1eb   : > { %v732_v15 = vpop.f32.mrf.mxu3 }
 0x1ec   : > { %v733_v36 = vadd.f32 %v1119_v26, %v732_v15 }
 0x1ee   : > { %v760_v43 = vmax.f32 %v733_v36, 0.0 }
 0x1ef   : > { %v711_v16 = vpop.f32.mrf.mxu1 }
 0x1f0   : > { %v712_v57 = vadd.f32 %v1119_v26, %v711_v16  ;;  %v1120_v16 = vld [vmem:[%s1618_s8] ss:$0 sm:$0xff] }
 0x1f2   : > { %v753_v0 = vmax.f32 %v712_v57, 0.0 }
 0x1f3   : > { %v735_v17 = vpop.f32.mrf.mxu3 }
 0x1f4   : > { %v736_v33 = vadd.f32 %v1119_v26, %v735_v17 }
 0x1f6   : > { %v761_v39 = vmax.f32 %v736_v33, 0.0 }
 0x1f7   : > { %v714_v19 = vpop.f32.mrf.mxu1 }
 0x1f8   : > { %v715_v54 = vadd.f32 %v1119_v26, %v714_v19 }
 0x1fa   : > { %v754_v61 = vmax.f32 %v715_v54, 0.0 }
 0x1fb   : > { %v738_v21 = vpop.f32.mrf.mxu3 }
 0x1fc   : > { %v739_v31 = vadd.f32 %v1119_v26, %v738_v21 }
 0x1fe   : > { %v762_v37 = vmax.f32 %v739_v31, 0.0 }
 0x1ff   : > { %v717_v22 = vpop.f32.mrf.mxu1 }
 0x200   : > { %v718_v51 = vadd.f32 %v1119_v26, %v717_v22 }
 0x202   : > { %v755_v58 = vmax.f32 %v718_v51, 0.0 }
 0x203   : > { %v741_v23 = vpop.f32.mrf.mxu3 }
 0x204   : > { %v742_v20 = vadd.f32 %v1119_v26, %v741_v23 }
 0x206   : > { %v763_v34 = vmax.f32 %v742_v20, 0.0 }
 0x207   : > { %v720_v24 = vpop.f32.mrf.mxu1 }
 0x208   : > { %v721_v49 = vadd.f32 %v1119_v26, %v720_v24 }
 0x20a   : > { %v756_v55 = vmax.f32 %v721_v49, 0.0 }
 0x20b   : > { %v744_v18 = vpop.f32.mrf.mxu3 }
 0x20c   : > { %v745_v28 = vadd.f32 %v1119_v26, %v744_v18 }
 0x20e   : > { %v764_v32 = vmax.f32 %v745_v28, 0.0 }
 0x20f   : > { %v723_v25 = vpop.f32.mrf.mxu1 }
 0x210   : > { %v724_v46 = vadd.f32 %v1119_v26, %v723_v25 }
 0x212   : > { %v757_v52 = vmax.f32 %v724_v46, 0.0 }
 0x213   : > { %v747_v27 = vpop.f32.mrf.mxu3 }
 0x214   : > { %v748_v29 = vadd.f32 %v1119_v26, %v747_v27 }
 0x216   : > { %v765_v30 = vmax.f32 %v748_v29, 0.0 }
 0x217   : > { %v726_v35 = vpop.f32.mrf.mxu1 }
 0x218   : > { %768 = vmatpush.msrb.mxu2 %v765_v30  ;;  %v727_v40 = vadd.f32 %v1119_v26, %v726_v35 }
 0x21a   : > { %769 = vmatpush.msrb.mxu2 %v764_v32  ;;  %v758_v47 = vmax.f32 %v727_v40, 0.0 }
 0x21c   : > { %770 = vmatpush.msrb.mxu2 %v763_v34 }
 0x21e   : > { %771 = vmatpush.msrb.mxu2 %v762_v37 }
 0x220   : > { %772 = vmatpush.msrb.mxu2 %v761_v39 }
 0x222   : > { %773 = vmatpush.msrb.mxu2 %v760_v43 }
 0x224   : > { %774 = vmatpush.msrb.mxu2 %v759_v45 }
 0x226   : > { %775 = vmatpush.msrb.mxu2 %v758_v47 }
 0x228   : > { %776 = vmatpush.msrb.mxu2 %v757_v52 }
 0x22a   : > { %777 = vmatpush.msrb.mxu2 %v756_v55 }
 0x22c   : > { %778 = vmatpush.msrb.mxu2 %v755_v58 }
 0x22e   : > { %779 = vmatpush.msrb.mxu2 %v754_v61 }
 0x230   : > { %780 = vmatpush.msrb.mxu2 %v753_v0 }
 0x232   : > { %781 = vmatpush.msrb.mxu2 %v752_v3 }
 0x234   : > { %782 = vmatpush.msrb.mxu2 %v751_v5 }
 0x236   : > { %783 = vmatpush.msrb.mxu2 %v750_v7 }
 0x237   : > { %784 = vmatmul.f32.vlgmr.msrb.gmra.mxu2 %v766_v8 }
 0x23f   : > { %787 = vmatmul.f32.gmra.mxu2 %v767_v13 }
 0x2ba   : > { %v785_v14 = vpop.f32.mrf.mxu2 }
 0x2bb   : > { %827 = vmatmul.f32.vlgmr.msrb.gmra.mxu3 %v785_v14 }
 0x2c2   : > { %v788_v15 = vpop.f32.mrf.mxu2 }
 0x2c3   : > { %830 = vmatmul.f32.gmra.mxu3 %v788_v15 }
 0x33e   : > { %v828_v17 = vpop.f32.mrf.mxu3 }
 0x33f   : > { %v829_v19 = vadd.f32 %v1120_v16, %v828_v17 }
 0x341   : > { %834 = vst [vmem:[%s401_s17] sm:$0xff] %v829_v19 }
 0x346   : > { %v831_v21 = vpop.f32.mrf.mxu3 }
 0x347   : > { %v832_v22 = vadd.f32 %v1120_v16, %v831_v21 }
 0x349   : > { %835 = vst [vmem:[%s401_s17 + $0x8] sm:$0xff] %v832_v22 }
 0x34a   : > { %1208 = shalt.err (!%p1205_p12)
}
 0x34b   : > { %s1257_s7 = smov 128   ;;  %s1258_s24 = smov 8  }
 0x34c   : > { %1058 = dma.vmem_to_hbm [thread:$0]  (%p1378_p3), %s850_s13, 256, %s852_s18, %s837_s21, %s1257_s7, %s1257_s7, %s1258_s24  }
 0x34d PF: > { %s866_s25 = sand.u32 1, %s1239_s30   ;;  %p1634_p13 = scmp.ge.s32.totalorder %s1251_s12, 2 }
 0x34e   : > { %s867_s22 = scalar_lea.sflag [#allocation4], %s866_s25 }
 0x34f   : > { %p1069_p0 = pnand %p1634_p13, %p1344_p6 }
 0x351   : > { %p1070_p5 = pneg %p1069_p0 }
 0x353   : > { %1234 = dma.done.wait (%p1070_p5), %s867_s22, 256  }
 0x354   : > { %1236 = vsyncadd (%p1070_p5), %s867_s22, 4294967040  ;;  %s1635_s27 = sld [smem:[#allocation11_spill]]  ;;  %p23_p7 = scmp.ge.s32.totalorder %s1362_s23, 4  }
 0x355   : > { %s1636_s11 = sld [smem:[#allocation12_spill]]  ;;  %s1637_s30 = smov %s1243_s10 }
 0x356   : > { %s1639_s12 = smov %s1362_s23  ;;  %25 = sbr.rel (!%p23_p7) target bundleno = 8 (0x8), region = 111 }
 0x35a   : > { %s1638_s10 = smov %s1635_s27 }
 0x35b   :  { %873 = vsyncpa [#allocation3], 1 }
 0x35c   :  { %875 = vsyncpa [#allocation3 + $0x1], 1 }
 0x35d   :  { %876 = vsyncpa [#allocation6], 1 }
 0x35e   :  { %877 = vsyncpa [#allocation4], 1 }
 0x35f   :  { %879 = vsyncpa [#allocation4 + $0x1], 1 }

</bundles_post_ra>
